<compile_context>
chip_gen: v5e
topology: v5e:2x2
jax: 0.10.0
libtpu: 0.0.40
codegen_flags: <defaults>
</compile_context>

<pallas_src>
import math

import jax
import jax.numpy as jnp
from jax.experimental import pallas as pl
from jax.experimental.pallas import tpu as pltpu


_MASK = -1e30          # "no edge" bias sentinel (pre-LeakyReLU)
_LEAKY_MASK = -1e20    # any real (hl+hr+he) score is >> this; the sentinel after
                       # LeakyReLU is ~ -2e29 < _LEAKY_MASK, which drives both the
                       # exp() underflow masking and the "row has no edge" test.


def _round_up(x, m):
    return ((x + m - 1) // m) * m


def _pick_tile(n, cap, align):
    """(tile, padded_n): tile is a multiple of `align`, ~<= cap, tile | padded_n >= n.
    Chooses the block count first so padding waste stays bounded (no ~2x blow-up for
    awkward n such as n = cap + 1)."""
    n = max(int(n), 1)
    align = int(align)
    cap = max(int(cap), align)
    n_al = _round_up(n, align)
    cap_al = _round_up(cap, align)
    nblk = -(-n_al // cap_al)
    tile = _round_up(-(-n_al // nblk), align)
    return tile, tile * nblk


def _largest_divisor_tile(n, cap):
    for t in (1024, 512, 256, 128, 64, 32, 16, 8):
        if t <= cap and n % t == 0:
            return t
    return n


def _tpu_vmem_capacity():
    try:
        return int(getattr(pltpu.get_tpu_info(), "vmem_capacity_bytes", 128 << 20))
    except Exception:
        return 128 << 20


def _vmem_limit_bytes():
    # Do NOT hard-code 64 MiB: v7x only has 64 MiB physical VMEM per TensorCore.
    cap = _tpu_vmem_capacity()
    return int(min(cap - (16 << 20), 100 << 20))


def _default_row_block():
    return 128 if _tpu_vmem_capacity() <= (64 << 20) else 256


def _default_nt_block():
    return 1024 if _tpu_vmem_capacity() <= (64 << 20) else 2048


# ----------------------------------------------------------------------------
# Head-major projection with fused attention-vector reduction
# ----------------------------------------------------------------------------
def _proj_kernel(x_ref, w_ref, a_ref, h_ref, s_ref):
    # x_ref: (tm, K) f32 ; w_ref: (1, K, D) f32 ; a_ref: (1, 1, D) f32
    h = jnp.dot(x_ref[...], w_ref[0], preferred_element_type=jnp.float32)    # (tm, D)
    h_ref[0] = h.astype(h_ref.dtype)
    s_ref[0] = jnp.sum(h * a_ref[0], axis=-1, keepdims=True)                 # (tm, 1)


def pallas_project_head_major(x, w_hm, a_hm, *, out_dtype=jnp.bfloat16, row_block=512):
    """x [Np, K] f32 (rows pre-padded), w_hm [nhead, K, D] f32, a_hm [nhead, 1, D] f32.
    Returns (h_hm [nhead, Np, D] out_dtype, s [nhead, Np, 1] f32) with
    h_hm[h] = x @ w_hm[h] and s[h] = (h_hm[h] * a_hm[h]).sum(-1)."""
    Np, K = x.shape
    nhead, K2, D = w_hm.shape
    assert K == K2
    tm = _largest_divisor_tile(Np, row_block)
    assert Np % tm == 0

    flops = 2 * Np * K * D * nhead + 2 * Np * D * nhead
    bytes_accessed = (4 * (Np * K + (Np // tm) * nhead * K * D + Np * nhead)
                      + Np * D * nhead * (2 if out_dtype == jnp.bfloat16 else 4))

    return pl.pallas_call(
        _proj_kernel,
        out_shape=(jax.ShapeDtypeStruct((nhead, Np, D), out_dtype),
                   jax.ShapeDtypeStruct((nhead, Np, 1), jnp.float32)),
        grid=(Np // tm, nhead),   # heads innermost: the x row block is reused across heads
        in_specs=[
            pl.BlockSpec((tm, K), lambda i, h: (i, 0)),
            pl.BlockSpec((1, K, D), lambda i, h: (h, 0, 0)),
            pl.BlockSpec((1, 1, D), lambda i, h: (h, 0, 0)),
        ],
        out_specs=(
            pl.BlockSpec((1, tm, D), lambda i, h: (h, i, 0)),
            pl.BlockSpec((1, tm, 1), lambda i, h: (h, i, 0)),
        ),
        compiler_params=pltpu.CompilerParams(
            dimension_semantics=("parallel", "parallel"),
            vmem_limit_bytes=_vmem_limit_bytes()),
        cost_estimate=pl.CostEstimate(flops=flops, transcendentals=0,
                                      bytes_accessed=bytes_accessed),
    )(x, w_hm, a_hm)


# ----------------------------------------------------------------------------
# Attention + aggregation kernel (flash-style over tail blocks)
# ----------------------------------------------------------------------------
def _make_hgn_attention_kernel(n_et, negative_slope, emit_attn):
    negative_slope = float(negative_slope)

    def kernel(he_ref, hl_ref, hr_ref, ht_ref, et_ref, *rest):
        if emit_attn:
            out_ref, attn_ref, m_sc, l_sc, acc_sc = rest
        else:
            out_ref, m_sc, l_sc, acc_sc = rest
        h = pl.program_id(1)            # head (middle grid axis)
        c = pl.program_id(2)            # tail-column block (innermost, "arbitrary")

        @pl.when(c == 0)
        def _init():
            m_sc[...] = jnp.full(m_sc.shape, _MASK, jnp.float32)
            l_sc[...] = jnp.zeros(l_sc.shape, jnp.float32)
            acc_sc[...] = jnp.zeros(acc_sc.shape, jnp.float32)

        hl = hl_ref[0]                               # (tr, 1) f32
        hr = hr_ref[0]                               # (1, tn) f32
        et = et_ref[...].astype(jnp.int32)           # (tr, tn) (int8 in HBM / VMEM)

        # Per-(head, edge-type) bias rebuilt from the tiny SMEM score table.
        # TODO(synk): cache the head-invariant (et == t) masks in VMEM scratch under
        # pl.when(h == 0) once the number of edge types is large enough to matter.
        bias = jnp.where(et == 0, he_ref[h, 0], _MASK)
        for t in range(1, n_et):
            bias = jnp.where(et == t, he_ref[h, t], bias)

        s = hl + hr + bias                                             # (tr, tn)
        s = jnp.where(s > 0.0, s, negative_slope * s)                  # LeakyReLU

        # flash-style online softmax over tail-column blocks
        m_prev = m_sc[...]
        m_new = jnp.maximum(m_prev, jnp.max(s, axis=-1, keepdims=True))
        alpha = jnp.exp(m_prev - m_new)
        # TODO(synk): on v6e/v7x the exp / p tile could run in bf16 (2x EUP); keep f32
        # so the same kernel is safe on v5e.
        p = jnp.exp(s - m_new)                                         # masked -> 0
        l_sc[...] = alpha * l_sc[...] + jnp.sum(p, axis=-1, keepdims=True)
        acc_sc[...] = alpha * acc_sc[...] + jnp.dot(
            p.astype(jnp.bfloat16), ht_ref[0], preferred_element_type=jnp.float32)
        m_sc[...] = m_new

        @pl.when(c == pl.num_programs(2) - 1)
        def _finalize():
            valid = (m_sc[...] > _LEAKY_MASK).astype(jnp.float32)      # row has >= 1 edge
            inv = pl.reciprocal(l_sc[...], approx=True) * valid
            out_ref[0] = (acc_sc[...] * inv).astype(out_ref.dtype)
            if emit_attn:
                attn_ref[0] = (p * inv).astype(attn_ref.dtype)

    return kernel


def pallas_hgn_attention(hl_t, hr_t, h_tail_hm, etype_mat, he_score, *,
                         tr, tn, negative_slope=0.2, return_attention=True,
                         attn_dtype=jnp.bfloat16):
    """Per-head SimpleHGN attention softmax + aggregation (all inputs pre-padded).

    hl_t      : [nhead, Nh_pad, 1]  f32   (a_l * h_head).sum(-1)
    hr_t      : [nhead, 1, Nt_pad]  f32   (a_r * h_tail).sum(-1)
    h_tail_hm : [nhead, Nt_pad, D]  bf16  projected tail features (head-major)
    etype_mat : [Nh_pad, Nt_pad]    int8  edge type per (head, tail), -1 = no edge
    he_score  : [nhead, n_et]       f32   per-(head, edge-type) attention score
    """
    nhead, Nh_pad, _ = hl_t.shape
    Nt_pad, D = h_tail_hm.shape[1], h_tail_hm.shape[2]
    n_et = int(he_score.shape[1])
    assert n_et >= 1
    assert etype_mat.shape == (Nh_pad, Nt_pad) and etype_mat.dtype == jnp.int8
    assert Nh_pad % tr == 0 and Nt_pad % tn == 0
    assert tr % 32 == 0 and tn % 128 == 0           # int8 sublane / lane tiling
    rblocks, cblocks = Nh_pad // tr, Nt_pad // tn
    if return_attention:
        # normalized attention tiles cannot be rescaled after write-back, so the dense
        # attention path uses a single tail block.
        assert cblocks == 1

    kernel = _make_hgn_attention_kernel(n_et, negative_slope, return_attention)

    out_shape = [jax.ShapeDtypeStruct((nhead, Nh_pad, D), jnp.float32)]
    out_specs = [pl.BlockSpec((1, tr, D), lambda r, h, c: (h, r, 0))]
    if return_attention:
        out_shape.append(jax.ShapeDtypeStruct((nhead, Nh_pad, Nt_pad), attn_dtype))
        out_specs.append(pl.BlockSpec((1, tr, tn), lambda r, h, c: (h, r, c)))

    flops = nhead * (2 * Nh_pad * Nt_pad * D + (8 + 2 * n_et) * Nh_pad * Nt_pad)
    transcendentals = nhead * Nh_pad * (Nt_pad + cblocks)
    bytes_accessed = (Nh_pad * Nt_pad                          # int8 etype (reused over heads)
                      + 4 * nhead * Nh_pad                     # hl
                      + 4 * rblocks * nhead * Nt_pad           # hr
                      + 2 * rblocks * nhead * Nt_pad * D       # bf16 h_tail stream
                      + 4 * nhead * Nh_pad * D                 # out
                      + (2 * nhead * Nh_pad * Nt_pad if return_attention else 0))

    results = pl.pallas_call(
        kernel,
        out_shape=tuple(out_shape),
        # row blocks outermost, heads middle (shared etype block reused across heads),
        # tail blocks innermost (reduction axis for the online softmax).
        grid=(rblocks, nhead, cblocks),
        in_specs=[
            pl.BlockSpec(memory_space=pltpu.MemorySpace.SMEM),      # he_score table
            pl.BlockSpec((1, tr, 1), lambda r, h, c: (h, r, 0)),    # hl
            pl.BlockSpec((1, 1, tn), lambda r, h, c: (h, 0, c)),    # hr
            pl.BlockSpec((1, tn, D), lambda r, h, c: (h, c, 0)),    # h_tail (bf16)
            pl.BlockSpec((tr, tn), lambda r, h, c: (r, c)),         # edge types (int8)
        ],
        out_specs=tuple(out_specs),
        scratch_shapes=[pltpu.VMEM((tr, 1), jnp.float32),           # running max
                        pltpu.VMEM((tr, 1), jnp.float32),           # running denom
                        pltpu.VMEM((tr, D), jnp.float32)],          # running accumulator
        compiler_params=pltpu.CompilerParams(
            # TODO(synk): on v7x (2 TensorCores) prefer more row blocks on the leading
            # parallel axis for megacore balance when rblocks is tiny.
            dimension_semantics=("parallel", "parallel", "arbitrary"),
            vmem_limit_bytes=_vmem_limit_bytes()),
        cost_estimate=pl.CostEstimate(flops=flops, transcendentals=transcendentals,
                                      bytes_accessed=bytes_accessed),
        # TODO(synk): sweep pipeline_mode=pl.Buffered(3) on the etype / h_tail specs if a
        # profile shows exposed DMA once the bf16 / int8 streams shrink the compute cover.
    )(he_score, hl_t, hr_t, h_tail_hm, etype_mat)

    out_hm = results[0]
    attn = results[1] if return_attention else None
    return out_hm, attn


# ----------------------------------------------------------------------------
# SimpleHGNLayer forward (Pallas-backed)
# ----------------------------------------------------------------------------
def build_etype_matrix(n_head, n_tail, head_ind, tail_ind, tmp_edge):
    """Dense [n_head, n_tail] int8 edge-type matrix (-1 = no edge).
    For a static graph, compute once and pass to simple_hgn_forward(etype_mat=...).
    Note: duplicate (head, tail) edges collapse to a single entry (multigraphs are
    outside this kernel's semantics)."""
    m = jnp.full((n_head, n_tail), -1, jnp.int32)
    m = m.at[head_ind, tail_ind].set(tmp_edge.astype(jnp.int32))
    return m.astype(jnp.int8)


def simple_hgn_forward(params, head_feat, tail_feat, head_ind, tail_ind, tmp_edge,
                       *, negative_slope=0.2, etype_mat=None, return_attention=True,
                       row_block=None, nt_block=None):
    """SimpleHGNLayer.forward (eval mode: dropouts = identity, node_residual=False,
    activation=None, spilt_edge=False).
    Returns (out [N_head, nhead*out_features], attn [nhead, N_head, N_tail] bf16 | None)."""
    nhead = params["nhead"]
    D = params["out_features_len"]
    ef = params["edge_feats_len"]
    K = params["in_features_len"]
    n_et = params["edge_emb"].shape[0]
    assert n_et <= 127                       # edge types carried as int8 (-1 = no edge)
    N_head = head_feat.shape[0]
    N_tail = tail_feat.shape[0]

    if row_block is None:
        row_block = _default_row_block()
    if nt_block is None:
        nt_block = _default_nt_block()

    # --- tiling shared by projection and attention (no re-pad glue between kernels) ---
    tr, Nh_pad = _pick_tile(N_head, max(row_block, 32), 32)
    if return_attention:
        tn, Nt_pad = _pick_tile(N_tail, _round_up(N_tail, 128), 128)   # single tail block
    else:
        tn, Nt_pad = _pick_tile(N_tail, max(nt_block, 128), 128)

    # --- tiny XLA glue: weight reshape + edge-type score table ------------------------
    W_hm = params["W"].reshape(K, nhead, D)
    e = (params["edge_emb"] @ params["W_e"]).reshape(n_et, nhead, ef)  # tiny: keep in XLA
    he_score = jnp.sum(params["a_e"] * e, axis=-1).T.astype(jnp.float32)     # [nhead, n_et]

    # h_l = (a_l * (head_feat @ W)).sum(-1): fold a_l into W — the dense projected head
    # features are never needed with node_residual=False / spilt_edge=False.
    w_l = jnp.einsum("khd,hd->kh", W_hm, params["a_l"][0])                   # [K, nhead]
    hl = head_feat.astype(jnp.float32) @ w_l                                 # [N_head, nhead]
    hl_t = jnp.pad(hl.T[:, :, None], ((0, 0), (0, Nh_pad - N_head), (0, 0)))

    # --- tail projection: head-major bf16 features + fused a_r reduction --------------
    x_tail = jnp.pad(tail_feat.astype(jnp.float32), ((0, Nt_pad - N_tail), (0, 0)))
    h_tail_hm, hr_col = pallas_project_head_major(
        x_tail,
        jnp.transpose(W_hm, (1, 0, 2)),                  # [nhead, K, D]  (weights-only)
        jnp.transpose(params["a_r"], (1, 0, 2)),         # [nhead, 1, D]
        out_dtype=jnp.bfloat16)
    hr_t = jnp.swapaxes(hr_col, 1, 2)                    # [nhead, 1, Nt_pad] (tiny)

    # --- dense int8 edge-type adjacency (-1 = no edge) --------------------------------
    if etype_mat is None:
        # TODO(synk): for a static graph, hoist this scatter out of the forward path.
        etype_mat = build_etype_matrix(N_head, N_tail, head_ind, tail_ind, tmp_edge)
    etype_p = jnp.pad(etype_mat.astype(jnp.int8),
                      ((0, Nh_pad - N_head), (0, Nt_pad - N_tail)),
                      constant_values=-1)

    out_hm, attn = pallas_hgn_attention(
        hl_t, hr_t, h_tail_hm, etype_p, he_score,
        tr=tr, tn=tn, negative_slope=negative_slope,
        return_attention=return_attention)

    # TODO(synk): a packed (N_head, nhead*D) output straight from the kernel needs either
    # D % 128 == 0 or an in-kernel head loop; keep the small XLA transpose for now.
    out = jnp.transpose(out_hm[:, :N_head, :], (1, 0, 2)).reshape(N_head, nhead * D)
    attn = attn[:, :N_head, :N_tail] if return_attention else None
    return out, attn


# ----------------------------------------------------------------------------
# Pure-JAX reference (segment-op formulation, mirrors the torch sparse path)
# ----------------------------------------------------------------------------
def reference_forward(params, head_feat, tail_feat, head_ind, tail_ind, tmp_edge,
                      negative_slope=0.2):
    nhead = params["nhead"]
    out_f = params["out_features_len"]
    ef = params["edge_feats_len"]
    N_head = head_feat.shape[0]

    h_head = (head_feat @ params["W"]).reshape(-1, nhead, out_f)
    h_tail = (tail_feat @ params["W"]).reshape(-1, nhead, out_f)
    e = (params["edge_emb"] @ params["W_e"]).reshape(-1, nhead, ef)

    h_e = jnp.sum(params["a_e"] * e, axis=-1)[tmp_edge]            # [E, nhead]
    h_l = jnp.sum(params["a_l"] * h_head, axis=-1)[head_ind]       # [E, nhead]
    h_r = jnp.sum(params["a_r"] * h_tail, axis=-1)[tail_ind]       # [E, nhead]
    att = h_l + h_r + h_e
    att = jnp.where(att > 0, att, negative_slope * att)

    row_max = jax.ops.segment_max(att, head_ind, num_segments=N_head)
    att = jnp.exp(att - row_max[head_ind])
    denom = jax.ops.segment_sum(att, head_ind, num_segments=N_head)
    attn = att / denom[head_ind]                                   # [E, nhead]
    msgs = attn[:, :, None] * h_tail[tail_ind]                     # [E, nhead, D]
    out = jax.ops.segment_sum(msgs, head_ind, num_segments=N_head)
    return out.reshape(N_head, -1), attn


# ----------------------------------------------------------------------------
# Deterministic parameter init (matches reset_parameters: U(-stdv, stdv))
# ----------------------------------------------------------------------------
def init_params(key, edge_feats_len, in_features_len, out_features_len, nhead, n_etypes):
    def reset(k, shape):
        stdv = math.sqrt(6.0 / (shape[-2] + shape[-1]))
        return jax.random.uniform(k, shape, jnp.float32, -stdv, stdv)

    ks = jax.random.split(key, 6)
    return {
        "edge_feats_len": edge_feats_len,
        "in_features_len": in_features_len,
        "out_features_len": out_features_len,
        "nhead": nhead,
        "W": reset(ks[0], (in_features_len, out_features_len * nhead)),
        "W_e": reset(ks[1], (edge_feats_len, edge_feats_len * nhead)),
        "a_l": reset(ks[2], (1, nhead, out_features_len)),
        "a_r": reset(ks[3], (1, nhead, out_features_len)),
        "a_e": reset(ks[4], (1, nhead, edge_feats_len)),
        "edge_emb": reset(ks[5], (n_etypes, edge_feats_len)),
    }


if __name__ == "__main__":
    # small shapes consistent with the module
    in_features_len = 32
    out_features_len = 16
    nhead = 2
    edge_feats_len = 8
    n_etypes = 3
    N_head = 10
    N_tail = 200     # > 128 so the tiled (online-softmax) path gets exercised below

    key = jax.random.PRNGKey(0)
    k_par, k_hf, k_tf, k_adj, k_et = jax.random.split(key, 5)

    params = init_params(k_par, edge_feats_len, in_features_len,
                         out_features_len, nhead, n_etypes)

    head_feat = jax.random.normal(k_hf, (N_head, in_features_len), jnp.float32)
    tail_feat = jax.random.normal(k_tf, (N_tail, in_features_len), jnp.float32)

    # random sparse bipartite adjacency (no duplicate edges by construction)
    adj_mask = jax.random.bernoulli(k_adj, 0.15, (N_head, N_tail))
    head_ind, tail_ind = jnp.nonzero(adj_mask)
    E = int(head_ind.shape[0])
    assert E > 0
    tmp_edge = jax.random.randint(k_et, (E,), 0, n_etypes)      # edge type per edge

    # full path: dense per-head attention returned (single tail block)
    out, attn = simple_hgn_forward(params, head_feat, tail_feat,
                                   head_ind, tail_ind, tmp_edge,
                                   return_attention=True)
    out = jax.block_until_ready(out)
    attn = jax.block_until_ready(attn)

    # tiled path: no dense attention output, multiple tail blocks -> online softmax
    out_tiled, _ = simple_hgn_forward(params, head_feat, tail_feat,
                                      head_ind, tail_ind, tmp_edge,
                                      return_attention=False, nt_block=128)
    out_tiled = jax.block_until_ready(out_tiled)

    ref_out, ref_attn = reference_forward(params, head_feat, tail_feat,
                                          head_ind, tail_ind, tmp_edge)

    assert out.shape == (N_head, nhead * out_features_len)
    assert attn.shape == (nhead, N_head, N_tail)

    # tolerances account for bf16 attn / h_tail streams and the EUP approx reciprocal
    assert jnp.allclose(out, ref_out, rtol=2e-2, atol=1e-2), (
        f"out max abs diff {jnp.max(jnp.abs(out - ref_out))}")
    assert jnp.allclose(out_tiled, ref_out, rtol=2e-2, atol=1e-2), (
        f"tiled out max abs diff {jnp.max(jnp.abs(out_tiled - ref_out))}")
    attn_at_edges = attn[:, head_ind, tail_ind].astype(jnp.float32).T      # [E, nhead]
    assert jnp.allclose(attn_at_edges, ref_attn, rtol=2e-2, atol=5e-3), (
        f"attn max abs diff {jnp.max(jnp.abs(attn_at_edges - ref_attn))}")

    # TODO(synk): feat_drop / attn_drop are identity (eval mode); spilt_edge / recorder
    # branches are host-side bookkeeping, not kernel work.
    print("KERNEL_OK")
</pallas_src>

<mosaic_0001>
module attributes {stable_mosaic.version = 11 : i64} {
  func.func @_proj_kernel(%arg0: i32, %arg1: i32, %arg2: memref<256x32xf32, #tpu.memory_space<vmem>>, %arg3: memref<1x32x16xf32, #tpu.memory_space<vmem>>, %arg4: memref<1x1x16xf32, #tpu.memory_space<vmem>>, %arg5: memref<1x256x16xbf16, #tpu.memory_space<vmem>>, %arg6: memref<1x256x1xf32, #tpu.memory_space<vmem>>) attributes {dimension_semantics = [#tpu.dimension_semantics<parallel>, #tpu.dimension_semantics<parallel>], iteration_bounds = array<i64: 1, 2>, scalar_prefetch = 0 : i64, scratch_operands = 0 : i64, tpu.core_type = #tpu.core_type<tc>, window_params = [{transform_indices = @transform_0, window_bounds = array<i64: 256, 32>}, {transform_indices = @transform_1, window_bounds = array<i64: 1, 32, 16>}, {transform_indices = @transform_2, window_bounds = array<i64: 1, 1, 16>}, {transform_indices = @transform_3, window_bounds = array<i64: 1, 256, 16>}, {transform_indices = @transform_4, window_bounds = array<i64: 1, 256, 1>}]} {
    %c0 = arith.constant 0 : index
    %c0_0 = arith.constant 0 : index
    %0 = vector.load %arg2[%c0, %c0_0] : memref<256x32xf32, #tpu.memory_space<vmem>>, vector<256x32xf32>
    %c0_1 = arith.constant 0 : index
    %c0_2 = arith.constant 0 : index
    %c0_3 = arith.constant 0 : index
    %1 = vector.load %arg3[%c0_1, %c0_2, %c0_3] : memref<1x32x16xf32, #tpu.memory_space<vmem>>, vector<1x32x16xf32>
    %2 = vector.shape_cast %1 : vector<1x32x16xf32> to vector<32x16xf32>
    %cst = arith.constant dense<0.000000e+00> : vector<256x16xf32>
    %3 = tpu.matmul %0, %2, %cst {dimension_numbers = #tpu.dot_dimension_numbers<[1], [0], [0], [1], [0, 0, 1, 1], [], []>} : vector<256x32xf32>, vector<32x16xf32>, vector<256x16xf32> -> vector<256x16xf32>
    %4 = arith.truncf %3 : vector<256x16xf32> to vector<256x16xbf16>
    %c0_4 = arith.constant 0 : index
    %c0_5 = arith.constant 0 : index
    %c0_6 = arith.constant 0 : index
    %5 = vector.load %arg5[%c0_4, %c0_5, %c0_6] : memref<1x256x16xbf16, #tpu.memory_space<vmem>>, vector<1x256x16xbf16>
    %6 = vector.shape_cast %5 : vector<1x256x16xbf16> to vector<256x16xbf16>
    %7 = vector.shape_cast %4 : vector<256x16xbf16> to vector<1x256x16xbf16>
    tpu.vector_store %arg5[%c0_4, %c0_5, %c0_6], %7 {strides = array<i32>} : memref<1x256x16xbf16, #tpu.memory_space<vmem>>, vector<1x256x16xbf16>,
    %c0_7 = arith.constant 0 : index
    %c0_8 = arith.constant 0 : index
    %c0_9 = arith.constant 0 : index
    %8 = vector.load %arg4[%c0_7, %c0_8, %c0_9] : memref<1x1x16xf32, #tpu.memory_space<vmem>>, vector<1x1x16xf32>
    %9 = vector.shape_cast %8 : vector<1x1x16xf32> to vector<1x16xf32>
    %10 = vector.broadcast %9 : vector<1x16xf32> to vector<256x16xf32>
    %11 = arith.mulf %3, %10 : vector<256x16xf32>
    %cst_10 = arith.constant dense<0.000000e+00> : vector<256xf32>
    %12 = vector.multi_reduction <add>, %11, %cst_10 [1] : vector<256x16xf32> to vector<256xf32>
    %13 = vector.shape_cast %12 : vector<256xf32> to vector<256x1xf32>
    %c0_11 = arith.constant 0 : index
    %c0_12 = arith.constant 0 : index
    %c0_13 = arith.constant 0 : index
    %14 = vector.load %arg6[%c0_11, %c0_12, %c0_13] : memref<1x256x1xf32, #tpu.memory_space<vmem>>, vector<1x256x1xf32>
    %15 = vector.shape_cast %14 : vector<1x256x1xf32> to vector<256x1xf32>
    %16 = vector.shape_cast %13 : vector<256x1xf32> to vector<1x256x1xf32>
    tpu.vector_store %arg6[%c0_11, %c0_12, %c0_13], %16 {strides = array<i32>} : memref<1x256x1xf32, #tpu.memory_space<vmem>>, vector<1x256x1xf32>,
    return
  }
  func.func @transform_0(%arg0: i32, %arg1: i32) -> (i32, i32) {
    %c0_i32 = arith.constant 0 : i32
    %c0_i32_0 = arith.constant 0 : i32
    return %arg0, %c0_i32 : i32, i32
  }
  func.func @transform_1(%arg0: i32, %arg1: i32) -> (i32, i32, i32) {
    %c0_i32 = arith.constant 0 : i32
    %c0_i32_0 = arith.constant 0 : i32
    %c0_i32_1 = arith.constant 0 : i32
    return %arg1, %c0_i32, %c0_i32_0 : i32, i32, i32
  }
  func.func @transform_2(%arg0: i32, %arg1: i32) -> (i32, i32, i32) {
    %c0_i32 = arith.constant 0 : i32
    %c0_i32_0 = arith.constant 0 : i32
    %c0_i32_1 = arith.constant 0 : i32
    return %arg1, %c0_i32, %c0_i32_0 : i32, i32, i32
  }
  func.func @transform_3(%arg0: i32, %arg1: i32) -> (i32, i32, i32) {
    %c0_i32 = arith.constant 0 : i32
    %c0_i32_0 = arith.constant 0 : i32
    return %arg1, %arg0, %c0_i32 : i32, i32, i32
  }
  func.func @transform_4(%arg0: i32, %arg1: i32) -> (i32, i32, i32) {
    %c0_i32 = arith.constant 0 : i32
    %c0_i32_0 = arith.constant 0 : i32
    return %arg1, %arg0, %c0_i32 : i32, i32, i32
  }
}

</mosaic_0001>

<bundles_post_ra>
// kernel: tpu_custom_call.1
= control target key start
LH: loop header
LB: loop body
LE: loop exit
PB: predicated region body
PF: predicated region fallthrough
CT: control target
= control target key end

     0   :  { %s1048_s15 = smov 0   ;;  %s1050_s16 = smov 0   ;;  %s1424_s0 = inlined_call_operand.vmem [shape: f32[256,32], index: 0, kind: input, shape index: {}]   ;;  %s1425_s1 = inlined_call_operand.vmem [shape: f32[2,32,16], index: 1, kind: input, shape index: {}]   ;;  %s1426_s2 = inlined_call_operand.vmem [shape: f32[2,1,16], index: 2, kind: input, shape index: {}]   ;;  %s1427_s3 = inlined_call_operand.vmem [shape: bf16[2,256,16], index: 3, kind: output, shape index: {0}]   ;;  %s1428_s4 = inlined_call_operand.vmem [shape: f32[2,256,1], index: 4, kind: output, shape index: {1}]  }
   0x1   :  { %s1052_s17 = smov 0  }
   0x2 LB: > { %s24_s18 = sadd.s32 1, %s1017_s16  ;;  %p918_p0 = scmp.ge.s32.totalorder %s1021_s17, 1  ;;  %s1021_s17 = sphi %s1052_s17, %s15_s17   ;;  %s1017_s16 = sphi %s1050_s16, %s1430_s16   ;;  %s1013_s15 = sphi %s1048_s15, %s1429_s15  }
   0x3   : > { %p25_p1 = scmp.ge.s32.totalorder %s24_s18, 2  ;;  %p200_p2 = scmp.lt.s32.totalorder %s1021_s17, 3 }
   0x5   : > { %s1432_s18 = smov (%p25_p1, %s24_s18), 0  ;;  %p201_p3 = pnand %p918_p0, %p200_p2 }
   0x6   : > { %p253_p4 = scmp.lt.s32.totalorder (!%p201_p3), %s1013_s15, 1 }
   0x7   : > { %204 = sbr.rel (%p201_p3) target bundleno = 356 (0x164), region = 32 }
   0xc   : > { %s1434_s15 = smov (!%p253_p4, %s1013_s15), 1  ;;  %v281_v4 = vld [vmem:[%s1424_s0] sm:$0xff]  ;;  %vm317_vm0 = vcmask 261120   ;;  %v282_v8 = vld [vmem:[%s1424_s0 + $0x8] sm:$0xff]  ;;  %v283_v12 = vld [vmem:[%s1424_s0 + $0x10] sm:$0xff]  ;;  %vm559_vm1 = vcmask 125952  }
   0xd   : > { %s959_s19 = sshll.u32 %s1434_s15, 5  ;;  %s260_s22 = scalar_lea.vmem %s1426_s2, %s1434_s15  ;;  %v297_v5 = vld [vmem:[%s1424_s0 + $0x80] sm:$0xff]  ;;  %v298_v9 = vld [vmem:[%s1424_s0 + $0x88] sm:$0xff]  ;;  %v307_v13 = vld [vmem:[%s1424_s0 + $0xd0] sm:$0xff]  ;;  %vm628_vm2 = vcmask 130048   ;;  %vm725_vm3 = vcmask 7168  }
   0xe   : > { %s257_s25 = scalar_lea.vmem %s1425_s1, %s959_s19  ;;  %v305_v6 = vld [vmem:[%s1424_s0 + $0xc0] sm:$0xff]  ;;  %v306_v10 = vld [vmem:[%s1424_s0 + $0xc8] sm:$0xff]  ;;  %v299_v14 = vld [vmem:[%s1424_s0 + $0x90] sm:$0xff]  ;;  %s960_s27 = sshll.u32 %s1434_s15, 7 }
   0xf   : > { %v316_v0 = vld [vmem:[%s257_s25 + $0x18] sm:$0xff]  ;;  %v315_v1 = vld [vmem:[%s257_s25 + $0x10] sm:$0xff]  ;;  %v314_v2 = vld [vmem:[%s257_s25 + $0x8] sm:$0xff]  ;;  %s1215_s6 = scalar_lea.vmem %s1427_s3, %s960_s27 }
  0x10   : > { %426 = vmatpush.msra.mxu0 %v316_v0  ;;  %963 = vmatpush.msra.mxu2 %v316_v0  ;;  %v313_v3 = vld [vmem:[%s257_s25] sm:$0xff]  ;;  %v290_v11 = vld [vmem:[%s1424_s0 + $0x48] sm:$0xff]  ;;  %v291_v15 = vld [vmem:[%s1424_s0 + $0x50] sm:$0xff] }
  0x11   : > { %964 = vmatpush.msra.mxu3 %v316_v0  ;;  %962 = vmatpush.msra.mxu1 %v316_v0  ;;  %v289_v7 = vld [vmem:[%s1424_s0 + $0x40] sm:$0xff]  ;;  %v284_v16 = vld [vmem:[%s1424_s0 + $0x18] sm:$0xff]  ;;  %v286_v24 = vld [vmem:[%s1424_s0 + $0x28] sm:$0xff] }
  0x12   : > { %427 = vmatpush.msra.mxu0 %v315_v1  ;;  %966 = vmatpush.msra.mxu2 %v315_v1  ;;  %v300_v17 = vld [vmem:[%s1424_s0 + $0x98] sm:$0xff]  ;;  %v285_v20 = vld [vmem:[%s1424_s0 + $0x20] sm:$0xff]  ;;  %v302_v25 = vld [vmem:[%s1424_s0 + $0xa8] sm:$0xff] }
  0x13   : > { %967 = vmatpush.msra.mxu3 %v315_v1  ;;  %965 = vmatpush.msra.mxu1 %v315_v1  ;;  %v308_v18 = vld [vmem:[%s1424_s0 + $0xd8] sm:$0xff]  ;;  %v301_v21 = vld [vmem:[%s1424_s0 + $0xa0] sm:$0xff]  ;;  %v310_v26 = vld [vmem:[%s1424_s0 + $0xe8] sm:$0xff] }
  0x14   : > { %428 = vmatpush.msra.mxu0 %v314_v2  ;;  %969 = vmatpush.msra.mxu2 %v314_v2  ;;  %v292_v19 = vld [vmem:[%s1424_s0 + $0x58] sm:$0xff]  ;;  %v309_v22 = vld [vmem:[%s1424_s0 + $0xe0] sm:$0xff]  ;;  %v294_v27 = vld [vmem:[%s1424_s0 + $0x68] sm:$0xff] }
  0x15   : > { %970 = vmatpush.msra.mxu3 %v314_v2  ;;  %968 = vmatpush.msra.mxu1 %v314_v2  ;;  %v293_v23 = vld [vmem:[%s1424_s0 + $0x60] sm:$0xff]  ;;  %v287_v28 = vld [vmem:[%s1424_s0 + $0x30] sm:$0xff]  ;;  %v288_v32 = vld [vmem:[%s1424_s0 + $0x38] sm:$0xff] }
  0x16   : > { %429 = vmatpush.msra.mxu0 %v313_v3  ;;  %972 = vmatpush.msra.mxu2 %v313_v3  ;;  %v303_v29 = vld [vmem:[%s1424_s0 + $0xb0] sm:$0xff]  ;;  %v304_v33 = vld [vmem:[%s1424_s0 + $0xb8] sm:$0xff]  ;;  %v1210_v36 = vld [vmem:[%s260_s22] ss:$0 sm:$0xff]  ;;  %s961_s22 = sshll.u32 %s1434_s15, 8 }
  0x17   : > { %973 = vmatpush.msra.mxu3 %v313_v3  ;;  %925 = vmatmul.msk.f32.vlgmr.msra.gmra.mxu0 %vm317_vm0, %v281_v4  ;;  %v311_v30 = vld [vmem:[%s1424_s0 + $0xf0] sm:$0xff]  ;;  %v312_v34 = vld [vmem:[%s1424_s0 + $0xf8] sm:$0xff]  ;;  %s1349_s9 = scalar_lea.vmem %s1428_s4, %s961_s22 }
  0x18   : > { %941 = vmatmul.msk.f32.vlgmr.msra.gmra.mxu2 %vm317_vm0, %v297_v5  ;;  %949 = vmatmul.msk.f32.vlgmr.msra.gmra.mxu3 %vm317_vm0, %v305_v6  ;;  %v295_v31 = vld [vmem:[%s1424_s0 + $0x70] sm:$0xff]  ;;  %v296_v35 = vld [vmem:[%s1424_s0 + $0x78] sm:$0xff] }
  0x19   : > { %971 = vmatpush.msra.mxu1 %v313_v3 }
  0x1a   : > { %933 = vmatmul.msk.f32.vlgmr.msra.gmra.mxu1 %vm317_vm0, %v289_v7 }
  0x1f   : > { %926 = vmatmul.msk.f32.gmra.mxu0 %vm317_vm0, %v282_v8 }
  0x20   : > { %942 = vmatmul.msk.f32.gmra.mxu2 %vm317_vm0, %v298_v9  ;;  %950 = vmatmul.msk.f32.gmra.mxu3 %vm317_vm0, %v306_v10 }
  0x22   : > { %934 = vmatmul.msk.f32.gmra.mxu1 %vm317_vm0, %v290_v11 }
  0x27   : > { %927 = vmatmul.msk.f32.gmra.mxu0 %vm317_vm0, %v283_v12 }
  0x28   : > { %951 = vmatmul.msk.f32.gmra.mxu3 %vm317_vm0, %v307_v13  ;;  %943 = vmatmul.msk.f32.gmra.mxu2 %vm317_vm0, %v299_v14 }
  0x2a   : > { %935 = vmatmul.msk.f32.gmra.mxu1 %vm317_vm0, %v291_v15 }
  0x2f   : > { %928 = vmatmul.msk.f32.gmra.mxu0 %vm317_vm0, %v284_v16 }
  0x30   : > { %944 = vmatmul.msk.f32.gmra.mxu2 %vm317_vm0, %v300_v17  ;;  %952 = vmatmul.msk.f32.gmra.mxu3 %vm317_vm0, %v308_v18 }
  0x32   : > { %936 = vmatmul.msk.f32.gmra.mxu1 %vm317_vm0, %v292_v19 }
  0x37   : > { %929 = vmatmul.msk.f32.gmra.mxu0 %vm317_vm0, %v285_v20 }
  0x38   : > { %945 = vmatmul.msk.f32.gmra.mxu2 %vm317_vm0, %v301_v21  ;;  %953 = vmatmul.msk.f32.gmra.mxu3 %vm317_vm0, %v309_v22 }
  0x3a   : > { %937 = vmatmul.msk.f32.gmra.mxu1 %vm317_vm0, %v293_v23 }
  0x3f   : > { %930 = vmatmul.msk.f32.gmra.mxu0 %vm317_vm0, %v286_v24 }
  0x40   : > { %946 = vmatmul.msk.f32.gmra.mxu2 %vm317_vm0, %v302_v25  ;;  %954 = vmatmul.msk.f32.gmra.mxu3 %vm317_vm0, %v310_v26 }
  0x42   : > { %938 = vmatmul.msk.f32.gmra.mxu1 %vm317_vm0, %v294_v27 }
  0x47   : > { %931 = vmatmul.msk.f32.gmra.mxu0 %vm317_vm0, %v287_v28 }
  0x48   : > { %947 = vmatmul.msk.f32.gmra.mxu2 %vm317_vm0, %v303_v29  ;;  %955 = vmatmul.msk.f32.gmra.mxu3 %vm317_vm0, %v311_v30 }
  0x4a   : > { %939 = vmatmul.msk.f32.gmra.mxu1 %vm317_vm0, %v295_v31 }
  0x4f   : > { %932 = vmatmul.msk.f32.gmra.mxu0 %vm317_vm0, %v288_v32 }
  0x50   : > { %948 = vmatmul.msk.f32.gmra.mxu2 %vm317_vm0, %v304_v33  ;;  %956 = vmatmul.msk.f32.gmra.mxu3 %vm317_vm0, %v312_v34 }
  0x52   : > { %940 = vmatmul.msk.f32.gmra.mxu1 %vm317_vm0, %v296_v35 }
  0x94   : > { %v431_v37 = vpop.f32.mrf.mxu0 }
  0x95   : > { %v527_v38 = vpack.c.bf16 %v431_v37, %v431_v37  ;;  %v596_v39 = vmul.f32 %v1210_v36, %v431_v37 }
  0x97   : > { %560 = vst.msk [vmem:[%s1215_s6] sm:$0xf] %vm559_vm1, %v527_v38  ;;  %v629_v40 = vsel %vm628_vm2, %v596_v39, 0.0  ;;  %v455_v41 = vpop.f32.mrf.mxu1 }
  0x98   : > { %630 = vadd.xlane.f32.xlu0 %v629_v40  ;;  %v535_v42 = vpack.c.bf16 %v455_v41, %v455_v41  ;;  %v604_v43 = vmul.f32 %v1210_v36, %v455_v41 }
  0x9a   : > { %568 = vst.msk [vmem:[%s1215_s6 + $0x20] sm:$0xf] %vm559_vm1, %v535_v42  ;;  %v653_v44 = vsel %vm628_vm2, %v604_v43, 0.0 }
  0x9b   : > { %v479_v45 = vpop.f32.mrf.mxu2  ;;  %v503_v46 = vpop.f32.mrf.mxu3  ;;  %654 = vadd.xlane.f32.xlu2 %v653_v44 }
  0x9c   : > { %v543_v47 = vpack.c.bf16 %v479_v45, %v479_v45  ;;  %v551_v48 = vpack.c.bf16 %v503_v46, %v503_v46  ;;  %v620_v49 = vmul.f32 %v1210_v36, %v503_v46  ;;  %v612_v50 = vmul.f32 %v1210_v36, %v479_v45  ;;  %v434_v51 = vpop.f32.mrf.mxu0 }
  0x9d   : > { %v528_v52 = vpack.c.bf16 %v434_v51, %v434_v51  ;;  %v597_v57 = vmul.f32 %v1210_v36, %v434_v51 }
  0x9e   : > { %576 = vst.msk [vmem:[%s1215_s6 + $0x40] sm:$0xf] %vm559_vm1, %v543_v47  ;;  %v677_v53 = vsel %vm628_vm2, %v612_v50, 0.0  ;;  %v701_v54 = vsel %vm628_vm2, %v620_v49, 0.0 }
  0x9f   : > { %584 = vst.msk [vmem:[%s1215_s6 + $0x60] sm:$0xf] %vm559_vm1, %v551_v48  ;;  %678 = vadd.xlane.f32.xlu1 %v677_v53  ;;  %v458_v55 = vpop.f32.mrf.mxu1  ;;  %v632_v4 = vsel %vm628_vm2, %v597_v57, 0.0 }
  0xa0   : > { %702 = vadd.xlane.f32.xlu0 %v701_v54  ;;  %561 = vst.msk [vmem:[%s1215_s6 + $0x4] sm:$0xf] %vm559_vm1, %v528_v52  ;;  %v536_v56 = vpack.c.bf16 %v458_v55, %v458_v55  ;;  %v605_v8 = vmul.f32 %v1210_v36, %v458_v55 }
  0xa2   : > { %569 = vst.msk [vmem:[%s1215_s6 + $0x24] sm:$0xf] %vm559_vm1, %v536_v56  ;;  %v656_v18 = vsel %vm628_vm2, %v605_v8, 0.0 }
  0xa3   : > { %v482_v58 = vpop.f32.mrf.mxu2  ;;  %v506_v59 = vpop.f32.mrf.mxu3 }
  0xa4   : > { %v544_v60 = vpack.c.bf16 %v482_v58, %v482_v58  ;;  %v613_v61 = vmul.f32 %v1210_v36, %v482_v58  ;;  %v552_v62 = vpack.c.bf16 %v506_v59, %v506_v59  ;;  %v621_v63 = vmul.f32 %v1210_v36, %v506_v59  ;;  %v437_v0 = vpop.f32.mrf.mxu0 }
  0xa5   : > { %v529_v1 = vpack.c.bf16 %v437_v0, %v437_v0  ;;  %v598_v6 = vmul.f32 %v1210_v36, %v437_v0 }
  0xa6   : > { %577 = vst.msk [vmem:[%s1215_s6 + $0x44] sm:$0xf] %vm559_vm1, %v544_v60  ;;  %v704_v2 = vsel %vm628_vm2, %v621_v63, 0.0  ;;  %v680_v3 = vsel %vm628_vm2, %v613_v61, 0.0 }
  0xa7   : > { %585 = vst.msk [vmem:[%s1215_s6 + $0x64] sm:$0xf] %vm559_vm1, %v552_v62  ;;  %705 = vadd.xlane.f32.xlu1 %v704_v2  ;;  %681 = vadd.xlane.f32.xlu2 %v680_v3  ;;  %v461_v5 = vpop.f32.mrf.mxu1  ;;  %v635_v13 = vsel %vm628_vm2, %v598_v6, 0.0 }
  0xa8   : > { %633 = vadd.xlane.f32.xlu0 %v632_v4  ;;  %562 = vst.msk [vmem:[%s1215_s6 + $0x8] sm:$0xf] %vm559_vm1, %v529_v1  ;;  %v537_v7 = vpack.c.bf16 %v461_v5, %v461_v5  ;;  %v606_v20 = vmul.f32 %v1210_v36, %v461_v5 }
  0xaa   : > { %570 = vst.msk [vmem:[%s1215_s6 + $0x28] sm:$0xf] %vm559_vm1, %v537_v7  ;;  %v659_v27 = vsel %vm628_vm2, %v606_v20, 0.0 }
  0xab   : > { %v509_v9 = vpop.f32.mrf.mxu3  ;;  %v485_v10 = vpop.f32.mrf.mxu2 }
  0xac   : > { %v553_v11 = vpack.c.bf16 %v509_v9, %v509_v9  ;;  %v622_v12 = vmul.f32 %v1210_v36, %v509_v9  ;;  %v440_v14 = vpop.f32.mrf.mxu0  ;;  %v545_v15 = vpack.c.bf16 %v485_v10, %v485_v10  ;;  %v614_v23 = vmul.f32 %v1210_v36, %v485_v10 }
  0xad   : > { %v530_v16 = vpack.c.bf16 %v440_v14, %v440_v14  ;;  %v599_v34 = vmul.f32 %v1210_v36, %v440_v14 }
  0xae   : > { %586 = vst.msk [vmem:[%s1215_s6 + $0x68] sm:$0xf] %vm559_vm1, %v553_v11  ;;  %v707_v17 = vsel %vm628_vm2, %v622_v12, 0.0  ;;  %v683_v31 = vsel %vm628_vm2, %v614_v23, 0.0 }
  0xaf   : > { %708 = vadd.xlane.f32.xlu2 %v707_v17  ;;  %636 = vadd.xlane.f32.xlu1 %v635_v13  ;;  %563 = vst.msk [vmem:[%s1215_s6 + $0xc] sm:$0xf] %vm559_vm1, %v530_v16  ;;  %v464_v19 = vpop.f32.mrf.mxu1  ;;  %v638_v41 = vsel %vm628_vm2, %v599_v34, 0.0 }
  0xb0   : > { %657 = vadd.xlane.f32.xlu0 %v656_v18  ;;  %v538_v21 = vpack.c.bf16 %v464_v19, %v464_v19  ;;  %v607_v22 = vmul.f32 %v1210_v36, %v464_v19  ;;  %578 = vst.msk [vmem:[%s1215_s6 + $0x48] sm:$0xf] %vm559_vm1, %v545_v15 }
  0xb2   : > { %571 = vst.msk [vmem:[%s1215_s6 + $0x2c] sm:$0xf] %vm559_vm1, %v538_v21  ;;  %v662_v26 = vsel %vm628_vm2, %v607_v22, 0.0 }
  0xb3   : > { %v488_v24 = vpop.f32.mrf.mxu2  ;;  %v512_v25 = vpop.f32.mrf.mxu3 }
  0xb4   : > { %v443_v28 = vpop.f32.mrf.mxu0  ;;  %v546_v29 = vpack.c.bf16 %v488_v24, %v488_v24  ;;  %v554_v30 = vpack.c.bf16 %v512_v25, %v512_v25  ;;  %v623_v38 = vmul.f32 %v1210_v36, %v512_v25  ;;  %v615_v48 = vmul.f32 %v1210_v36, %v488_v24 }
  0xb5   : > { %v531_v32 = vpack.c.bf16 %v443_v28, %v443_v28  ;;  %v600_v35 = vmul.f32 %v1210_v36, %v443_v28 }
  0xb6   : > { %579 = vst.msk [vmem:[%s1215_s6 + $0x4c] sm:$0xf] %vm559_vm1, %v546_v29  ;;  %v710_v46 = vsel %vm628_vm2, %v623_v38, 0.0  ;;  %v686_v53 = vsel %vm628_vm2, %v615_v48, 0.0 }
  0xb7   : > { %663 = vadd.xlane.f32.xlu2 %v662_v26  ;;  %660 = vadd.xlane.f32.xlu1 %v659_v27  ;;  %564 = vst.msk [vmem:[%s1215_s6 + $0x10] sm:$0xf] %vm559_vm1, %v531_v32  ;;  %v467_v33 = vpop.f32.mrf.mxu1  ;;  %v641_v42 = vsel %vm628_vm2, %v600_v35, 0.0 }
  0xb8   : > { %684 = vadd.xlane.f32.xlu0 %v683_v31  ;;  %587 = vst.msk [vmem:[%s1215_s6 + $0x6c] sm:$0xf] %vm559_vm1, %v554_v30  ;;  %v539_v37 = vpack.c.bf16 %v467_v33, %v467_v33  ;;  %v608_v52 = vmul.f32 %v1210_v36, %v467_v33 }
  0xba   : > { %572 = vst.msk [vmem:[%s1215_s6 + $0x30] sm:$0xf] %vm559_vm1, %v539_v37  ;;  %v665_v61 = vsel %vm628_vm2, %v608_v52, 0.0 }
  0xbb   : > { %v491_v39 = vpop.f32.mrf.mxu2  ;;  %v515_v40 = vpop.f32.mrf.mxu3 }
  0xbc   : > { %v547_v43 = vpack.c.bf16 %v491_v39, %v491_v39  ;;  %v446_v44 = vpop.f32.mrf.mxu0  ;;  %v555_v45 = vpack.c.bf16 %v515_v40, %v515_v40  ;;  %v616_v50 = vmul.f32 %v1210_v36, %v491_v39  ;;  %v624_v2 = vmul.f32 %v1210_v36, %v515_v40 }
  0xbd   : > { %v532_v47 = vpack.c.bf16 %v446_v44, %v446_v44  ;;  %v601_v1 = vmul.f32 %v1210_v36, %v446_v44 }
  0xbe   : > { %580 = vst.msk [vmem:[%s1215_s6 + $0x50] sm:$0xf] %vm559_vm1, %v547_v43  ;;  %v689_v56 = vsel %vm628_vm2, %v616_v50, 0.0  ;;  %v713_v7 = vsel %vm628_vm2, %v624_v2, 0.0 }
  0xbf   : > { %639 = vadd.xlane.f32.xlu1 %v638_v41  ;;  %642 = vadd.xlane.f32.xlu2 %v641_v42  ;;  %565 = vst.msk [vmem:[%s1215_s6 + $0x14] sm:$0xf] %vm559_vm1, %v532_v47  ;;  %v470_v49 = vpop.f32.mrf.mxu1  ;;  %v644_v8 = vsel %vm628_vm2, %v601_v1, 0.0 }
  0xc0   : > { %711 = vadd.xlane.f32.xlu0 %v710_v46  ;;  %v540_v51 = vpack.c.bf16 %v470_v49, %v470_v49  ;;  %588 = vst.msk [vmem:[%s1215_s6 + $0x70] sm:$0xf] %vm559_vm1, %v555_v45  ;;  %v609_v21 = vmul.f32 %v1210_v36, %v470_v49 }
  0xc2   : > { %573 = vst.msk [vmem:[%s1215_s6 + $0x34] sm:$0xf] %vm559_vm1, %v540_v51  ;;  %v668_v28 = vsel %vm628_vm2, %v609_v21, 0.0 }
  0xc3   : > { %v494_v54 = vpop.f32.mrf.mxu2  ;;  %v518_v55 = vpop.f32.mrf.mxu3 }
  0xc4   : > { %v548_v57 = vpack.c.bf16 %v494_v54, %v494_v54  ;;  %v449_v58 = vpop.f32.mrf.mxu0  ;;  %v556_v59 = vpack.c.bf16 %v518_v55, %v518_v55  ;;  %v625_v60 = vmul.f32 %v1210_v36, %v518_v55  ;;  %v617_v6 = vmul.f32 %v1210_v36, %v494_v54 }
  0xc5   : > { %v533_v62 = vpack.c.bf16 %v449_v58, %v449_v58  ;;  %v602_v63 = vmul.f32 %v1210_v36, %v449_v58 }
  0xc6   : > { %581 = vst.msk [vmem:[%s1215_s6 + $0x54] sm:$0xf] %vm559_vm1, %v548_v57  ;;  %v716_v0 = vsel %vm628_vm2, %v625_v60, 0.0  ;;  %v692_v16 = vsel %vm628_vm2, %v617_v6, 0.0 }
  0xc7   : > { %687 = vadd.xlane.f32.xlu1 %v686_v53  ;;  %690 = vadd.xlane.f32.xlu2 %v689_v56  ;;  %v473_v3 = vpop.f32.mrf.mxu1  ;;  %566 = vst.msk [vmem:[%s1215_s6 + $0x18] sm:$0xf] %vm559_vm1, %v533_v62  ;;  %v647_v4 = vsel %vm628_vm2, %v602_v63, 0.0 }
  0xc8   : > { %666 = vadd.xlane.f32.xlu0 %v665_v61  ;;  %v541_v5 = vpack.c.bf16 %v473_v3, %v473_v3  ;;  %589 = vst.msk [vmem:[%s1215_s6 + $0x74] sm:$0xf] %vm559_vm1, %v556_v59  ;;  %v610_v22 = vmul.f32 %v1210_v36, %v473_v3 }
  0xca   : > { %574 = vst.msk [vmem:[%s1215_s6 + $0x38] sm:$0xf] %vm559_vm1, %v541_v5  ;;  %v671_v29 = vsel %vm628_vm2, %v610_v22, 0.0 }
  0xcb   : > { %v497_v9 = vpop.f32.mrf.mxu2  ;;  %v521_v10 = vpop.f32.mrf.mxu3 }
  0xcc   : > { %v549_v11 = vpack.c.bf16 %v497_v9, %v497_v9  ;;  %v618_v12 = vmul.f32 %v1210_v36, %v497_v9  ;;  %v452_v13 = vpop.f32.mrf.mxu0  ;;  %v557_v14 = vpack.c.bf16 %v521_v10, %v521_v10  ;;  %v626_v15 = vmul.f32 %v1210_v36, %v521_v10 }
  0xcd   : > { %v534_v17 = vpack.c.bf16 %v452_v13, %v452_v13  ;;  %v603_v18 = vmul.f32 %v1210_v36, %v452_v13 }
  0xce   : > { %582 = vst.msk [vmem:[%s1215_s6 + $0x58] sm:$0xf] %vm559_vm1, %v549_v11  ;;  %v695_v19 = vsel %vm628_vm2, %v618_v12, 0.0  ;;  %v719_v20 = vsel %vm628_vm2, %v626_v15, 0.0 }
  0xcf   : > { %714 = vadd.xlane.f32.xlu1 %v713_v7  ;;  %645 = vadd.xlane.f32.xlu2 %v644_v8  ;;  %v476_v23 = vpop.f32.mrf.mxu1  ;;  %567 = vst.msk [vmem:[%s1215_s6 + $0x1c] sm:$0xf] %vm559_vm1, %v534_v17  ;;  %v650_v24 = vsel %vm628_vm2, %v603_v18, 0.0 }
  0xd0   : > { %693 = vadd.xlane.f32.xlu0 %v692_v16  ;;  %v542_v25 = vpack.c.bf16 %v476_v23, %v476_v23  ;;  %v611_v26 = vmul.f32 %v1210_v36, %v476_v23  ;;  %590 = vst.msk [vmem:[%s1215_s6 + $0x78] sm:$0xf] %vm559_vm1, %v557_v14 }
  0xd2   : > { %575 = vst.msk [vmem:[%s1215_s6 + $0x3c] sm:$0xf] %vm559_vm1, %v542_v25  ;;  %v674_v27 = vsel %vm628_vm2, %v611_v26, 0.0 }
  0xd3   : > { %v500_v30 = vpop.f32.mrf.mxu2  ;;  %v524_v31 = vpop.f32.mrf.mxu3 }
  0xd4   : > { %v550_v32 = vpack.c.bf16 %v500_v30, %v500_v30  ;;  %v619_v33 = vmul.f32 %v1210_v36, %v500_v30  ;;  %v558_v34 = vpack.c.bf16 %v524_v31, %v524_v31  ;;  %v627_v35 = vmul.f32 %v1210_v36, %v524_v31 }
  0xd6   : > { %583 = vst.msk [vmem:[%s1215_s6 + $0x5c] sm:$0xf] %vm559_vm1, %v550_v32  ;;  %v698_v37 = vsel %vm628_vm2, %v619_v33, 0.0  ;;  %v722_v38 = vsel %vm628_vm2, %v627_v35, 0.0 }
  0xd7   : > { %669 = vadd.xlane.f32.xlu1 %v668_v28  ;;  %672 = vadd.xlane.f32.xlu2 %v671_v29  ;;  %591 = vst.msk [vmem:[%s1215_s6 + $0x7c] sm:$0xf] %vm559_vm1, %v558_v34 }
  0xd8   : > { %648 = vadd.xlane.f32.xlu0 %v647_v4 }
  0xdf   : > { %696 = vadd.xlane.f32.xlu1 %v695_v19  ;;  %699 = vadd.xlane.f32.xlu2 %v698_v37 }
  0xe0   : > { %675 = vadd.xlane.f32.xlu0 %v674_v27 }
  0xe7   : > { %717 = vadd.xlane.f32.xlu2 %v716_v0  ;;  %651 = vadd.xlane.f32.xlu1 %v650_v24 }
  0xe8   : > { %720 = vadd.xlane.f32.xlu0 %v719_v20 }
  0xef   : > { %723 = vadd.xlane.f32.xlu1 %v722_v38 }
 0x10b   : > { %v631_v36 = vpop.xlane.xlu0 %630 }
 0x10c   : > { %726 = vst.msk [vmem:[%s1349_s9] sm:$0xff] %vm725_vm3, %v631_v36 }
 0x10e   : > { %v655_v39 = vpop.xlane.xlu2 %654 }
 0x10f   : > { %734 = vst.msk [vmem:[%s1349_s9 + $0x40] sm:$0xff] %vm725_vm3, %v655_v39 }
 0x112   : > { %v679_v40 = vpop.xlane.xlu1 %678 }
 0x113   : > { %742 = vst.msk [vmem:[%s1349_s9 + $0x80] sm:$0xff] %vm725_vm3, %v679_v40  ;;  %v703_v41 = vpop.xlane.xlu0 %702 }
 0x114   : > { %750 = vst.msk [vmem:[%s1349_s9 + $0xc0] sm:$0xff] %vm725_vm3, %v703_v41 }
 0x11a   : > { %v706_v42 = vpop.xlane.xlu1 %705  ;;  %v682_v43 = vpop.xlane.xlu2 %681 }
 0x11b   : > { %751 = vst.msk [vmem:[%s1349_s9 + $0xc8] sm:$0xff] %vm725_vm3, %v706_v42  ;;  %v634_v44 = vpop.xlane.xlu0 %633 }
 0x11c   : > { %743 = vst.msk [vmem:[%s1349_s9 + $0x88] sm:$0xff] %vm725_vm3, %v682_v43 }
 0x11d   : > { %727 = vst.msk [vmem:[%s1349_s9 + $0x8] sm:$0xff] %vm725_vm3, %v634_v44 }
 0x122   : > { %v709_v45 = vpop.xlane.xlu2 %708  ;;  %v637_v46 = vpop.xlane.xlu1 %636 }
 0x123   : > { %752 = vst.msk [vmem:[%s1349_s9 + $0xd0] sm:$0xff] %vm725_vm3, %v709_v45  ;;  %v658_v47 = vpop.xlane.xlu0 %657 }
 0x124   : > { %728 = vst.msk [vmem:[%s1349_s9 + $0x10] sm:$0xff] %vm725_vm3, %v637_v46 }
 0x125   : > { %735 = vst.msk [vmem:[%s1349_s9 + $0x48] sm:$0xff] %vm725_vm3, %v658_v47 }
 0x12a   : > { %v664_v48 = vpop.xlane.xlu2 %663  ;;  %v661_v49 = vpop.xlane.xlu1 %660 }
 0x12b   : > { %737 = vst.msk [vmem:[%s1349_s9 + $0x58] sm:$0xff] %vm725_vm3, %v664_v48  ;;  %v685_v50 = vpop.xlane.xlu0 %684 }
 0x12c   : > { %736 = vst.msk [vmem:[%s1349_s9 + $0x50] sm:$0xff] %vm725_vm3, %v661_v49 }
 0x12d   : > { %744 = vst.msk [vmem:[%s1349_s9 + $0x90] sm:$0xff] %vm725_vm3, %v685_v50 }
 0x132   : > { %v640_v51 = vpop.xlane.xlu1 %639  ;;  %v643_v52 = vpop.xlane.xlu2 %642 }
 0x133   : > { %729 = vst.msk [vmem:[%s1349_s9 + $0x18] sm:$0xff] %vm725_vm3, %v640_v51  ;;  %v712_v53 = vpop.xlane.xlu0 %711 }
 0x134   : > { %730 = vst.msk [vmem:[%s1349_s9 + $0x20] sm:$0xff] %vm725_vm3, %v643_v52 }
 0x135   : > { %753 = vst.msk [vmem:[%s1349_s9 + $0xd8] sm:$0xff] %vm725_vm3, %v712_v53 }
 0x13a   : > { %v688_v54 = vpop.xlane.xlu1 %687  ;;  %v691_v55 = vpop.xlane.xlu2 %690 }
 0x13b   : > { %745 = vst.msk [vmem:[%s1349_s9 + $0x98] sm:$0xff] %vm725_vm3, %v688_v54  ;;  %v667_v56 = vpop.xlane.xlu0 %666 }
 0x13c   : > { %746 = vst.msk [vmem:[%s1349_s9 + $0xa0] sm:$0xff] %vm725_vm3, %v691_v55 }
 0x13d   : > { %738 = vst.msk [vmem:[%s1349_s9 + $0x60] sm:$0xff] %vm725_vm3, %v667_v56 }
 0x142   : > { %v715_v57 = vpop.xlane.xlu1 %714  ;;  %v646_v58 = vpop.xlane.xlu2 %645 }
 0x143   : > { %754 = vst.msk [vmem:[%s1349_s9 + $0xe0] sm:$0xff] %vm725_vm3, %v715_v57  ;;  %v694_v59 = vpop.xlane.xlu0 %693 }
 0x144   : > { %731 = vst.msk [vmem:[%s1349_s9 + $0x28] sm:$0xff] %vm725_vm3, %v646_v58 }
 0x145   : > { %747 = vst.msk [vmem:[%s1349_s9 + $0xa8] sm:$0xff] %vm725_vm3, %v694_v59 }
 0x14a   : > { %v670_v60 = vpop.xlane.xlu1 %669  ;;  %v673_v61 = vpop.xlane.xlu2 %672 }
 0x14b   : > { %739 = vst.msk [vmem:[%s1349_s9 + $0x68] sm:$0xff] %vm725_vm3, %v670_v60  ;;  %v649_v62 = vpop.xlane.xlu0 %648 }
 0x14c   : > { %740 = vst.msk [vmem:[%s1349_s9 + $0x70] sm:$0xff] %vm725_vm3, %v673_v61 }
 0x14d   : > { %732 = vst.msk [vmem:[%s1349_s9 + $0x30] sm:$0xff] %vm725_vm3, %v649_v62 }
 0x152   : > { %v697_v63 = vpop.xlane.xlu1 %696  ;;  %v700_v0 = vpop.xlane.xlu2 %699 }
 0x153   : > { %748 = vst.msk [vmem:[%s1349_s9 + $0xb0] sm:$0xff] %vm725_vm3, %v697_v63  ;;  %v676_v1 = vpop.xlane.xlu0 %675 }
 0x154   : > { %749 = vst.msk [vmem:[%s1349_s9 + $0xb8] sm:$0xff] %vm725_vm3, %v700_v0 }
 0x155   : > { %741 = vst.msk [vmem:[%s1349_s9 + $0x78] sm:$0xff] %vm725_vm3, %v676_v1 }
 0x15a   : > { %v718_v2 = vpop.xlane.xlu2 %717  ;;  %v652_v3 = vpop.xlane.xlu1 %651 }
 0x15b   : > { %755 = vst.msk [vmem:[%s1349_s9 + $0xe8] sm:$0xff] %vm725_vm3, %v718_v2  ;;  %v721_v4 = vpop.xlane.xlu0 %720 }
 0x15c   : > { %733 = vst.msk [vmem:[%s1349_s9 + $0x38] sm:$0xff] %vm725_vm3, %v652_v3 }
 0x15d   : > { %756 = vst.msk [vmem:[%s1349_s9 + $0xf0] sm:$0xff] %vm725_vm3, %v721_v4 }
 0x162   : > { %v724_v5 = vpop.xlane.xlu1 %723 }
 0x163   : > { %757 = vst.msk [vmem:[%s1349_s9 + $0xf8] sm:$0xff] %vm725_vm3, %v724_v5 }
 0x164 PF: > { %s15_s17 = sadd.s32 1, %s1021_s17   ;;  %s1429_s15 = smov %s1017_s16 }
 0x165   : > { %p12_p5 = scmp.ge.s32.totalorder %s15_s17, 4   ;;  %s1430_s16 = smov %s1432_s18 }
 0x167   :  { %14 = sbr.rel (!%p12_p5) target bundleno = 2 (0x2), region = 80 }

</bundles_post_ra>
